<compile_context>
chip_gen: v7x
topology: tpu7x:2x2x1
jax: 0.10.0
libtpu: 0.0.40
codegen_flags: <defaults>
</compile_context>

<pallas_src>
import jax
import jax.numpy as jnp
from jax.experimental import pallas as pl
from jax.experimental.pallas import tpu as pltpu


# ----------------------------------------------------------------------------
# Demo Pallas kernel (identity copy).  NOT part of Agent_2's semantics — the
# original forward() has no body — it only proves the Pallas path works.
# ----------------------------------------------------------------------------
def _identity_kernel(x_ref, o_ref):
    o_ref[...] = x_ref[...]


def pallas_identity(x, *, tile_r=128, tile_c=256):
    """Identity copy with small, lane-dense (8,128)-aligned tiles."""
    R, C = x.shape
    tile_r = min(tile_r, R)
    tile_c = min(tile_c, C)
    grid = (pl.cdiv(R, tile_r), pl.cdiv(C, tile_c))
    return pl.pallas_call(
        _identity_kernel,
        out_shape=jax.ShapeDtypeStruct((R, C), x.dtype),
        grid=grid,
        in_specs=[pl.BlockSpec((tile_r, tile_c), lambda i, j: (i, j))],
        out_specs=pl.BlockSpec((tile_r, tile_c), lambda i, j: (i, j)),
        compiler_params=pltpu.CompilerParams(
            # Both grid axes are independent -> shard across v7x's 2 TCs.
            dimension_semantics=("parallel", "parallel"),
        ),
    )(x)


# ----------------------------------------------------------------------------
# Agent_2 equivalent
# ----------------------------------------------------------------------------
class Agent2:
    """JAX/Pallas equivalent of the (empty) PyTorch Agent_2 module."""

    def __init__(self):
        # TODO(synk): Agent_2.__init__ defines no layers; nothing to port.
        pass

    def forward(self):
        """Original forward() is 'todo' / pass: no inputs, returns None."""
        # TODO(synk): Agent_2.forward has no body; no Pallas compute to lower.
        return None

    __call__ = forward


if __name__ == "__main__":
    key = jax.random.PRNGKey(0)

    # Small deterministic input; one compile, one run.
    x = jax.random.normal(key, (256, 512), dtype=jnp.float32)
    y = pallas_identity(x)
    jax.block_until_ready(y)
    assert y.shape == x.shape and y.dtype == x.dtype
    assert bool(jnp.array_equal(y, x))

    # Faithful Agent_2 forward: no args, returns None.
    agent = Agent2()
    out = agent()
    assert out is None

    print("KERNEL_OK")
</pallas_src>

<mosaic_0001>
module attributes {stable_mosaic.version = 11 : i64} {
  func.func @_identity_kernel(%arg0: i32, %arg1: i32, %arg2: memref<128x256xf32, #tpu.memory_space<vmem>>, %arg3: memref<128x256xf32, #tpu.memory_space<vmem>>) attributes {dimension_semantics = [#tpu.dimension_semantics<parallel>, #tpu.dimension_semantics<parallel>], iteration_bounds = array<i64: 2, 2>, scalar_prefetch = 0 : i64, scratch_operands = 0 : i64, tpu.core_type = #tpu.core_type<tc>, window_params = [{transform_indices = @transform_0, window_bounds = array<i64: 128, 256>}, {transform_indices = @transform_1, window_bounds = array<i64: 128, 256>}]} {
    %c0 = arith.constant 0 : index
    %c0_0 = arith.constant 0 : index
    %0 = vector.load %arg2[%c0, %c0_0] : memref<128x256xf32, #tpu.memory_space<vmem>>, vector<128x256xf32>
    %c0_1 = arith.constant 0 : index
    %c0_2 = arith.constant 0 : index
    %1 = vector.load %arg3[%c0_1, %c0_2] : memref<128x256xf32, #tpu.memory_space<vmem>>, vector<128x256xf32>
    tpu.vector_store %arg3[%c0_1, %c0_2], %0 {strides = array<i32>} : memref<128x256xf32, #tpu.memory_space<vmem>>, vector<128x256xf32>,
    return
  }
  func.func @transform_0(%arg0: i32, %arg1: i32) -> (i32, i32) {
    %c0_i32 = arith.constant 0 : i32
    return %arg0, %arg1 : i32, i32
  }
  func.func @transform_1(%arg0: i32, %arg1: i32) -> (i32, i32) {
    %c0_i32 = arith.constant 0 : i32
    return %arg0, %arg1 : i32, i32
  }
}

</mosaic_0001>

<bundles_post_ra>
// kernel: tpu_custom_call.1
= control target key start
LH: loop header
LB: loop body
LE: loop exit
PB: predicated region body
PF: predicated region fallthrough
CT: control target
= control target key end

     0   :  { %6 = vsyncpa [#allocation3], 0  ;;  %s851_s0 = inlined_call_operand.hbm [shape: f32[256,512], index: 0, kind: input, shape index: {}]   ;;  %s852_s1 = inlined_call_operand.hbm [shape: f32[256,512], index: 1, kind: output, shape index: {}]  }
   0x1   :  { %8 = vsyncpa [#allocation3 + $0x1], 0 }
   0x2   :  { %9 = vsyncpa [#allocation4], 0 }
   0x3   :  { %11 = vsyncpa [#allocation4 + $0x1], 0  ;;  %s582_s6 = smov 0   ;;  %s584_s7 = smov 0  }
   0x4   :  { %s586_s8 = smov 0   ;;  %s588_s9 = smov 0  }
   0x5   :  { %s590_s10 = smov 0   ;;  %s592_s11 = smov 0  }
   0x6   :  { %s594_s12 = smov 0   ;;  %s596_s13 = smov 0  }
   0x7 LB: > { %s329_s14 = sadd.s32 4294967295, %s562_s13   ;;  %s330_s15 = sadd.s32 4294967294, %s562_s13   ;;  %s562_s13 = sphi %s596_s13, %s17_s13   ;;  %s558_s12 = sphi %s594_s12, %s868_s12   ;;  %s554_s11 = sphi %s592_s11, %s867_s11   ;;  %s550_s10 = sphi %s590_s10, %s866_s10   ;;  %s546_s9 = sphi %s588_s9, %s865_s9   ;;  %s542_s8 = sphi %s586_s8, %s864_s8   ;;  %s538_s7 = sphi %s584_s7, %s863_s7   ;;  %s534_s6 = sphi %s582_s6, %s862_s6  }
   0x8   : > { %s26_s16 = sadd.s32 1, %s554_s11  ;;  %s29_s17 = sadd.s32 1, %s558_s12 }
   0x9   : > { %p27_p0 = scmp.ge.s32.totalorder %s26_s16, 2  ;;  %s38_s18 = sadd.s32 1, %s542_s8 }
   0xa   : > { %p45_p1 = scmp.ne.s32.totalorder %s542_s8, %s538_s7  ;;  %p46_p2 = scmp.eq.s32.totalorder %s562_s13, 0 }
   0xb   : > { %s870_s16 = smov (%p27_p0, %s26_s16), 0  ;;  %s872_s17 = smov (!%p27_p0, %s29_s17), %s558_s12 }
   0xc   : > { %s34_s19 = ssub.s32 %s554_s11, %s870_s16  ;;  %p635_p3 = por %p46_p2, %p45_p1 }
   0xd   : > { %p31_p4 = scmp.ge.s32.totalorder %s872_s17, 2  ;;  %p51_p5 = scmp.ne.s32.totalorder %s538_s7, %s534_s6 }
   0xe   : > { %p52_p6 = scmp.eq.s32.totalorder %s329_s14, 0  ;;  %p77_p7 = scmp.eq.s32.totalorder %s329_s14, 3 }
   0xf   : > { %s874_s17 = smov (%p31_p4, %s872_s17), 0  ;;  %p83_p10 = scmp.eq.s32.totalorder %s330_s15, 3 }
  0x10   : > { %p643_p8 = por %p52_p6, %p51_p5  ;;  %p647_p9 = por %p77_p7, %p45_p1 }
  0x11   : > { %s33_s23 = ssub.s32 %s558_s12, %s874_s17  ;;  %p653_p12 = por %p83_p10, %p51_p5 }
  0x12   : > { %s856_s22 = scalar_select %p647_p9, 1, 0 }
  0x13   : > { %s35_s24 = sor.u32 %s34_s19, %s33_s23  ;;  %p362_p13 = scmp.lt.s32.totalorder %s562_s13, 4 }
  0x14   : > { %p36_p11 = scmp.eq.s32.totalorder %s35_s24, 0  ;;  %s103_s26 = sand.u32 1, %s542_s8  }
  0x15   : > { %s857_s25 = scalar_select %p653_p12, 1, 0 }
  0x16   : > { %s660_s27 = scalar_select %p36_p11, %s542_s8, %s38_s18  }
  0x17   : > { %s333_s28 = sshll.u32 %s103_s26, 8  ;;  %s335_s29 = sshll.u32 %s554_s11, 1 }
  0x18   : > { %s348_s30 = sshll.u32 %s558_s12, 6  ;;  %s107_s2 = scalar_lea.vmem [#allocation2], %s333_s28 }
  0x19   : > { %s117_s3 = sshll.u32 %s107_s2, 4  ;;  %s114_s4 = sadd.s32 %s348_s30, %s335_s29  ;;  %s664_s3 = int_to_ptr.vmem [resolvable:$true] %s117_s3 }
  0x1a   : > { %s337_s5 = sshll.u32 %s114_s4, 7  ;;  %p668_p0 = pnand %p362_p13, %p635_p3 }
  0x1b   : > { %s675_s18 = scalar_lea.hbm %s851_s0, %s337_s5  ;;  %s678_s23 = scalar_lea.sflag [#allocation3], %s103_s26 }
  0x1c   : > { %s434_s24 = scalar_lea.hbm %s675_s18, 4096  ;;  %p436_p3 = pneg %p668_p0 }
  0x1d   : > { %p435_p2 = scmp.ne.s32.totalorder %s675_s18, %s434_s24  ;;  %s439_s29 = scalar_lea.hbm %s851_s0, 16384 }
  0x1e   : > { %p440_p6 = scmp.lt.u32.totalorder %s675_s18, %s851_s0  ;;  %p441_p7 = scmp.lt.u32.totalorder %s439_s29, %s434_s24 }
  0x1f   : > { %p437_p4 = pnand %p436_p3, %p435_p2  ;;  %p443_p11 = scmp.lt.u32.totalorder %s434_s24, %s675_s18 }
  0x20   : > { %p442_p10 = por %p441_p7, %p440_p6 }
  0x21   : > { %p438_p5 = pneg %p437_p4 }
  0x22   : > { %p444_p13 = por %p443_p11, %p442_p10 }
  0x24   : > { %p445_p1 = pnand %p444_p13, %p438_p5 }
  0x26   : > { %448 = shalt.err (!%p445_p1)
}
  0x27   : > { %s449_s26 = scalar_lea.vmem %s664_s3, 4096  ;;  %s564_s4 = smov [#allocation2]  }
  0x28   : > { %p450_p2 = scmp.ne.s32.totalorder %s664_s3, %s449_s26  ;;  %s454_s5 = sshll.u32 %s564_s4, 4  ;;  %s455_s5 = int_to_ptr.vmem [resolvable:$false] %s454_s5 }
  0x29   : > { %s456_s15 = scalar_lea.vmem %s455_s5, 8192  ;;  %p457_p9 = scmp.lt.s32.totalorder %s664_s3, %s455_s5 }
  0x2a   : > { %p452_p4 = pnand %p450_p2, %p436_p3  ;;  %p458_p6 = scmp.lt.s32.totalorder %s456_s15, %s449_s26 }
  0x2c   : > { %p453_p12 = pneg %p452_p4  ;;  %p459_p7 = por %p458_p6, %p457_p9 }
  0x2e   : > { %p460_p10 = pnand %p459_p7, %p453_p12 }
  0x30   : > { %463 = shalt.err (!%p460_p10)
}
  0x31   : > { %s565_s19 = smov 512   ;;  %s566_s24 = smov 256  }
  0x32   : > { %s567_s20 = smov 16   ;;  %p125_p1 = scmp.lt.s32.totalorder %s562_s13, 5 }
  0x33   : > { %357 = dma.hbm_to_vmem [thread:$0]  (!%p668_p0), %s675_s18, 4096, %s664_s3, %s678_s23, %s565_s19, %s566_s24, %s567_s20  }
  0x34   : > { %p859_p3 = scmp.ge.s32.totalorder %s562_s13, 1 }
  0x36   : > { %p126_p5 = pnand %p859_p3, %p125_p1 }
  0x37   : > { %s710_s28 = sand.u32 (!%p126_p5), 1, %s538_s7  }
  0x38   : > { %129 = sbr.rel (%p126_p5) target bundleno = 97 (0x61), region = 24  ;;  %s339_s29 = sshll.u32 (!%p126_p5), %s710_s28, 8 }
  0x39   : > { %s132_s30 = scalar_lea.sflag (!%p126_p5), [#allocation3], %s710_s28  ;;  %s714_s2 = scalar_lea.vmem (!%p126_p5), [#allocation2], %s339_s29 }
  0x3f   : > { %525 = dma.done.wait (%p643_p8), %s132_s30, 4096  }
  0x40   : > { %527 = vsyncadd (%p643_p8), %s132_s30, 4294963200  ;;  %s343_s3 = sshll.u32 %s546_s9, 1  ;;  %s349_s14 = sshll.u32 %s550_s10, 6  ;;  %v158_v0 = vld [vmem:[%s714_s2] sm:$0xff]  ;;  %v159_v1 = vld [vmem:[%s714_s2 + $0x8] sm:$0xff] }
  0x41   : > { %v160_v2 = vld [vmem:[%s714_s2 + $0x10] sm:$0xff]  ;;  %s725_s18 = scalar_lea.vmem [#allocation5], %s339_s29  ;;  %v161_v3 = vld [vmem:[%s714_s2 + $0x18] sm:$0xff]  ;;  %v162_v4 = vld [vmem:[%s714_s2 + $0x20] sm:$0xff]  ;;  %s739_s9 = sadd.s32 %s349_s14, %s343_s3 }
  0x42   : > { %190 = vst [vmem:[%s725_s18] sm:$0xff] %v158_v0  ;;  %191 = vst [vmem:[%s725_s18 + $0x8] sm:$0xff] %v159_v1  ;;  %v163_v5 = vld [vmem:[%s714_s2 + $0x28] sm:$0xff]  ;;  %v164_v6 = vld [vmem:[%s714_s2 + $0x30] sm:$0xff]  ;;  %s239_s10 = sshll.u32 %s725_s18, 4  ;;  %s345_s21 = sshll.u32 %s739_s9, 7  ;;  %s773_s10 = int_to_ptr.vmem [resolvable:$true] %s239_s10 }
  0x43   : > { %192 = vst [vmem:[%s725_s18 + $0x10] sm:$0xff] %v160_v2  ;;  %193 = vst [vmem:[%s725_s18 + $0x18] sm:$0xff] %v161_v3  ;;  %v165_v7 = vld [vmem:[%s714_s2 + $0x38] sm:$0xff]  ;;  %v166_v8 = vld [vmem:[%s714_s2 + $0x40] sm:$0xff]  ;;  %s784_s4 = scalar_lea.hbm %s852_s1, %s345_s21  ;;  %s223_s5 = scalar_lea.sflag [#allocation4], %s710_s28 }
  0x44   : > { %194 = vst [vmem:[%s725_s18 + $0x20] sm:$0xff] %v162_v4  ;;  %195 = vst [vmem:[%s725_s18 + $0x28] sm:$0xff] %v163_v5  ;;  %v167_v9 = vld [vmem:[%s714_s2 + $0x48] sm:$0xff]  ;;  %v168_v10 = vld [vmem:[%s714_s2 + $0x50] sm:$0xff]  ;;  %s464_s15 = scalar_lea.vmem %s773_s10, 4096  ;;  %p860_p9 = scmp.ne.s32.totalorder %s856_s22, 0 }
  0x45   : > { %196 = vst [vmem:[%s725_s18 + $0x30] sm:$0xff] %v164_v6  ;;  %197 = vst [vmem:[%s725_s18 + $0x38] sm:$0xff] %v165_v7  ;;  %v169_v11 = vld [vmem:[%s714_s2 + $0x58] sm:$0xff]  ;;  %v170_v12 = vld [vmem:[%s714_s2 + $0x60] sm:$0xff]  ;;  %p465_p8 = scmp.ne.s32.totalorder %s773_s10, %s464_s15  ;;  %s568_s19 = smov [#allocation5]  }
  0x46   : > { %198 = vst [vmem:[%s725_s18 + $0x40] sm:$0xff] %v166_v8  ;;  %199 = vst [vmem:[%s725_s18 + $0x48] sm:$0xff] %v167_v9  ;;  %v171_v13 = vld [vmem:[%s714_s2 + $0x68] sm:$0xff]  ;;  %v172_v14 = vld [vmem:[%s714_s2 + $0x70] sm:$0xff]  ;;  %s468_s24 = sshll.u32 %s568_s19, 4  ;;  %s469_s24 = int_to_ptr.vmem [resolvable:$false] %s468_s24 }
  0x47   : > { %200 = vst [vmem:[%s725_s18 + $0x50] sm:$0xff] %v168_v10  ;;  %201 = vst [vmem:[%s725_s18 + $0x58] sm:$0xff] %v169_v11  ;;  %v173_v15 = vld [vmem:[%s714_s2 + $0x78] sm:$0xff]  ;;  %v174_v16 = vld [vmem:[%s714_s2 + $0x80] sm:$0xff]  ;;  %p466_p12 = pnand %p465_p8, %p860_p9  ;;  %s470_s20 = scalar_lea.vmem %s469_s24, 8192 }
  0x48   : > { %202 = vst [vmem:[%s725_s18 + $0x60] sm:$0xff] %v170_v12  ;;  %203 = vst [vmem:[%s725_s18 + $0x68] sm:$0xff] %v171_v13  ;;  %v175_v17 = vld [vmem:[%s714_s2 + $0x88] sm:$0xff]  ;;  %v176_v18 = vld [vmem:[%s714_s2 + $0x90] sm:$0xff]  ;;  %p471_p11 = scmp.lt.s32.totalorder %s773_s10, %s469_s24  ;;  %p472_p13 = scmp.lt.s32.totalorder %s470_s20, %s464_s15 }
  0x49   : > { %204 = vst [vmem:[%s725_s18 + $0x70] sm:$0xff] %v172_v14  ;;  %205 = vst [vmem:[%s725_s18 + $0x78] sm:$0xff] %v173_v15  ;;  %v177_v19 = vld [vmem:[%s714_s2 + $0x98] sm:$0xff]  ;;  %v178_v20 = vld [vmem:[%s714_s2 + $0xa0] sm:$0xff]  ;;  %p467_p0 = pneg %p466_p12 }
  0x4a   : > { %206 = vst [vmem:[%s725_s18 + $0x80] sm:$0xff] %v174_v16  ;;  %207 = vst [vmem:[%s725_s18 + $0x88] sm:$0xff] %v175_v17  ;;  %v179_v21 = vld [vmem:[%s714_s2 + $0xa8] sm:$0xff]  ;;  %v180_v22 = vld [vmem:[%s714_s2 + $0xb0] sm:$0xff]  ;;  %p473_p2 = por %p472_p13, %p471_p11 }
  0x4b   : > { %208 = vst [vmem:[%s725_s18 + $0x90] sm:$0xff] %v176_v18  ;;  %209 = vst [vmem:[%s725_s18 + $0x98] sm:$0xff] %v177_v19  ;;  %v181_v23 = vld [vmem:[%s714_s2 + $0xb8] sm:$0xff]  ;;  %v182_v24 = vld [vmem:[%s714_s2 + $0xc0] sm:$0xff] }
  0x4c   : > { %210 = vst [vmem:[%s725_s18 + $0xa0] sm:$0xff] %v178_v20  ;;  %211 = vst [vmem:[%s725_s18 + $0xa8] sm:$0xff] %v179_v21  ;;  %v183_v25 = vld [vmem:[%s714_s2 + $0xc8] sm:$0xff]  ;;  %v184_v26 = vld [vmem:[%s714_s2 + $0xd0] sm:$0xff]  ;;  %p474_p4 = pnand %p473_p2, %p467_p0 }
  0x4d   : > { %212 = vst [vmem:[%s725_s18 + $0xb0] sm:$0xff] %v180_v22  ;;  %213 = vst [vmem:[%s725_s18 + $0xb8] sm:$0xff] %v181_v23  ;;  %v185_v27 = vld [vmem:[%s714_s2 + $0xd8] sm:$0xff]  ;;  %v186_v28 = vld [vmem:[%s714_s2 + $0xe0] sm:$0xff] }
  0x4e   : > { %214 = vst [vmem:[%s725_s18 + $0xc0] sm:$0xff] %v182_v24  ;;  %215 = vst [vmem:[%s725_s18 + $0xc8] sm:$0xff] %v183_v25  ;;  %v187_v29 = vld [vmem:[%s714_s2 + $0xe8] sm:$0xff]  ;;  %v188_v30 = vld [vmem:[%s714_s2 + $0xf0] sm:$0xff] }
  0x4f   : > { %216 = vst [vmem:[%s725_s18 + $0xd0] sm:$0xff] %v184_v26  ;;  %217 = vst [vmem:[%s725_s18 + $0xd8] sm:$0xff] %v185_v27  ;;  %v189_v31 = vld [vmem:[%s714_s2 + $0xf8] sm:$0xff] }
  0x50   : > { %218 = vst [vmem:[%s725_s18 + $0xe0] sm:$0xff] %v186_v28  ;;  %219 = vst [vmem:[%s725_s18 + $0xe8] sm:$0xff] %v187_v29 }
  0x51   : > { %220 = vst [vmem:[%s725_s18 + $0xf0] sm:$0xff] %v188_v30  ;;  %221 = vst [vmem:[%s725_s18 + $0xf8] sm:$0xff] %v189_v31 }
  0x52   : > { %477 = shalt.err (!%p474_p4)
}
  0x53   : > { %s478_s29 = scalar_lea.hbm %s784_s4, 4096  ;;  %s482_s3 = scalar_lea.hbm %s852_s1, 16384 }
  0x54   : > { %p479_p6 = scmp.ne.s32.totalorder %s784_s4, %s478_s29  ;;  %p483_p1 = scmp.lt.u32.totalorder %s784_s4, %s852_s1 }
  0x55   : > { %p484_p3 = scmp.lt.u32.totalorder %s482_s3, %s478_s29  ;;  %p486_p8 = scmp.lt.u32.totalorder %s478_s29, %s784_s4 }
  0x56   : > { %p480_p7 = pnand %p479_p6, %p860_p9 }
  0x57   : > { %p485_p5 = por %p484_p3, %p483_p1 }
  0x58   : > { %p481_p10 = pneg %p480_p7 }
  0x59   : > { %p487_p12 = por %p486_p8, %p485_p5 }
  0x5b   : > { %p488_p0 = pnand %p487_p12, %p481_p10 }
  0x5d   : > { %491 = shalt.err (!%p488_p0)
}
  0x5e   : > { %s569_s9 = smov 256   ;;  %s570_s21 = smov 512  }
  0x5f   : > { %s571_s23 = smov 16  }
  0x60   : > { %352 = dma.vmem_to_hbm [thread:$0]  (%p860_p9), %s773_s10, 4096, %s784_s4, %s223_s5, %s569_s9, %s570_s21, %s571_s23  }
  0x61 PF: > { %p363_p11 = scmp.ge.s32.totalorder %s562_s13, 2  ;;  %s254_s26 = sand.u32 1, %s534_s6  }
  0x62   : > { %p861_p13 = scmp.ne.s32.totalorder %s857_s25, 0  ;;  %s255_s15 = scalar_lea.sflag [#allocation4], %s254_s26 }
  0x64   : > { %p359_p2 = pnand %p363_p11, %p861_p13 }
  0x66   : > { %529 = dma.done.wait (!%p359_p2), %s255_s15, 4096  }
  0x67   : > { %531 = vsyncadd (!%p359_p2), %s255_s15, 4294963200  ;;  %s17_s13 = sadd.s32 1, %s562_s13   ;;  %s862_s6 = smov %s538_s7 }
  0x68   : > { %p14_p4 = scmp.ge.s32.totalorder %s17_s13, 6   ;;  %s863_s7 = smov %s542_s8 }
  0x69   : > { %s864_s8 = smov %s660_s27  ;;  %s865_s9 = smov %s554_s11 }
  0x6a   : > { %s866_s10 = smov %s558_s12  ;;  %s867_s11 = smov %s870_s16 }
  0x6b   : > { %s868_s12 = smov %s874_s17  ;;  %16 = sbr.rel (!%p14_p4) target bundleno = 7 (0x7), region = 69 }
  0x72   :  { %260 = vsyncpa [#allocation3], 1 }
  0x73   :  { %262 = vsyncpa [#allocation3 + $0x1], 1 }
  0x74   :  { %263 = vsyncpa [#allocation4], 1 }
  0x75   :  { %265 = vsyncpa [#allocation4 + $0x1], 1 }

</bundles_post_ra>
